<compile_context>
chip_gen: v7x
topology: tpu7x:2x2x1
jax: 0.10.0
libtpu: 0.0.40
codegen_flags: <defaults>
</compile_context>

<pallas_src>
import functools
import math

import jax
import jax.numpy as jnp
from jax.experimental import pallas as pl
from jax.experimental.pallas import tpu as pltpu


def _dual_attn_kernel(q_ref, k_ref, v1_ref, v2_ref, o1_ref, o2_ref, *, num_heads):
    # Block is (1, S, D): one batch row, all heads at once.
    q = q_ref[0]      # (S, D), f32
    k = k_ref[0]
    v1 = v1_ref[0]
    v2 = v2_ref[0]

    s, d = q.shape
    h = num_heads
    dh = d // h
    scale = jnp.float32(1.0 / math.sqrt(dh))
    neg_inf = jnp.float32(-1.0e9)

    # create_mask(..., mask=0): allowed positions are the STRICT lower
    # triangle (np.triu(ones, k=0) == 0); everything else gets -1e9.
    row = jax.lax.broadcasted_iota(jnp.int32, (s, s), 0)
    col = jax.lax.broadcasted_iota(jnp.int32, (s, s), 1)
    allowed = col < row

    # Fold the softmax scale into Q once (f32), then bf16 operands for the
    # MXU; accumulation stays f32.  Masked entries are still set to exactly
    # -1e9 afterwards, matching torch's masked_fill order.
    qb = (q * scale).astype(jnp.bfloat16)
    kb = k.astype(jnp.bfloat16)
    v1b = v1.astype(jnp.bfloat16)
    v2b = v2.astype(jnp.bfloat16)

    contract_last = (((1,), (1,)), ((), ()))  # 'qd,kd->qk', no transposed copy of k

    o1_parts = []
    o2_parts = []
    for hi in range(h):                       # static unroll over heads
        lo = hi * dh
        q_h = qb[:, lo:lo + dh]               # (S, Dh)
        k_h = kb[:, lo:lo + dh]               # (S, Dh)

        scores = jax.lax.dot_general(
            q_h, k_h, contract_last, preferred_element_type=jnp.float32)
        scores = jnp.where(allowed, scores, neg_inf)

        # Numerically-stable softmax in f32.  A fully-masked first row reduces
        # to a uniform distribution, exactly like torch.softmax over -1e9.
        m = jnp.max(scores, axis=-1, keepdims=True)
        e = jnp.exp(scores - m)
        p = e * pl.reciprocal(jnp.sum(e, axis=-1, keepdims=True), approx=True)

        # Fused PV matmul: one dot against [v1_h | v2_h]  -> (S, 2*Dh).
        v_h = jnp.concatenate([v1b[:, lo:lo + dh], v2b[:, lo:lo + dh]], axis=-1)
        o = jnp.dot(p.astype(jnp.bfloat16), v_h,
                    preferred_element_type=jnp.float32)
        o1_parts.append(o[:, :dh])
        o2_parts.append(o[:, dh:])

    # Single lane-dense (S, D) write per output, heads packed along lanes.
    o1_ref[0] = jnp.concatenate(o1_parts, axis=-1).astype(o1_ref.dtype)
    o2_ref[0] = jnp.concatenate(o2_parts, axis=-1).astype(o2_ref.dtype)


def dual_attention(q, k, v1, v2, num_attn_heads):
    """JAX/Pallas equivalent of DualAttention.forward (inference).

    Args:
      q, k, v1, v2: (B, S, d_model) arrays (float32).
      num_attn_heads: H; must divide d_model.

    Returns:
      (output_v1, output_v2), each (B, S, d_model), dtype of q.
    """
    b, s, d_model = q.shape
    h = num_attn_heads
    assert d_model % h == 0

    kernel = functools.partial(_dual_attn_kernel, num_heads=h)
    row_spec = pl.BlockSpec((1, s, d_model), lambda i: (i, 0, 0))

    elem_bytes = q.dtype.itemsize
    cost = pl.CostEstimate(
        flops=6 * b * s * s * d_model,               # QK (2*S*S*D) + fused PV (4*S*S*D)
        transcendentals=b * h * s * s,               # exp in the softmax
        bytes_accessed=6 * b * s * d_model * elem_bytes,
    )

    o1, o2 = pl.pallas_call(
        kernel,
        out_shape=(
            jax.ShapeDtypeStruct((b, s, d_model), q.dtype),
            jax.ShapeDtypeStruct((b, s, d_model), q.dtype),
        ),
        grid_spec=pltpu.PrefetchScalarGridSpec(
            num_scalar_prefetch=0,
            grid=(b,),
            in_specs=[row_spec, row_spec, row_spec, row_spec],
            out_specs=[row_spec, row_spec],
        ),
        compiler_params=pltpu.CompilerParams(
            dimension_semantics=("parallel",),
        ),
        cost_estimate=cost,
    )(q, k, v1, v2)
    return o1, o2


def _reference(q, k, v1, v2, num_attn_heads):
    """Pure-JAX f32 reference mirroring the PyTorch forward (no dropout)."""
    b, s, d_model = q.shape
    h = num_attn_heads
    dh = d_model // h

    def split(x):
        return x.reshape(b, s, h, dh).transpose(0, 2, 1, 3)  # (B,H,S,Dh)

    qh, kh, v1h, v2h = split(q), split(k), split(v1), split(v2)
    scores = jnp.einsum("bhqd,bhkd->bhqk", qh, kh) / math.sqrt(dh)
    row = jnp.arange(s)[:, None]
    col = jnp.arange(s)[None, :]
    allowed = col < row
    scores = jnp.where(allowed[None, None], scores, -1.0e9)
    p = jax.nn.softmax(scores, axis=-1)
    o1 = jnp.einsum("bhqk,bhkd->bhqd", p, v1h)
    o2 = jnp.einsum("bhqk,bhkd->bhqd", p, v2h)

    def merge(x):
        return x.transpose(0, 2, 1, 3).reshape(b, s, d_model)

    return merge(o1), merge(o2)


if __name__ == "__main__":
    B, S, D_MODEL, H = 2, 8, 32, 4  # d_model % num_heads == 0, Dh = 8

    key = jax.random.PRNGKey(0)
    kq, kk, kv1, kv2 = jax.random.split(key, 4)
    q = jax.random.normal(kq, (B, S, D_MODEL), dtype=jnp.float32)
    k = jax.random.normal(kk, (B, S, D_MODEL), dtype=jnp.float32)
    v1 = jax.random.normal(kv1, (B, S, D_MODEL), dtype=jnp.float32)
    v2 = jax.random.normal(kv2, (B, S, D_MODEL), dtype=jnp.float32)

    out1, out2 = dual_attention(q, k, v1, v2, H)
    out1 = jax.block_until_ready(out1)
    out2 = jax.block_until_ready(out2)

    ref1, ref2 = _reference(q, k, v1, v2, H)
    assert out1.shape == (B, S, D_MODEL) and out2.shape == (B, S, D_MODEL)
    # Kernel matmuls run in bf16 on the MXU (f32 accumulation / softmax), so
    # compare against the f32 reference at a bf16-appropriate tolerance.
    assert jnp.allclose(out1, ref1, atol=5e-2, rtol=5e-2)
    assert jnp.allclose(out2, ref2, atol=5e-2, rtol=5e-2)

    print("KERNEL_OK")
</pallas_src>

<mosaic_0001>
module attributes {stable_mosaic.version = 11 : i64} {
  func.func @_dual_attn_kernel(%arg0: i32, %arg1: memref<1x8x32xf32, #tpu.memory_space<vmem>>, %arg2: memref<1x8x32xf32, #tpu.memory_space<vmem>>, %arg3: memref<1x8x32xf32, #tpu.memory_space<vmem>>, %arg4: memref<1x8x32xf32, #tpu.memory_space<vmem>>, %arg5: memref<1x8x32xf32, #tpu.memory_space<vmem>>, %arg6: memref<1x8x32xf32, #tpu.memory_space<vmem>>) attributes {dimension_semantics = [#tpu.dimension_semantics<parallel>], iteration_bounds = array<i64: 2>, scalar_prefetch = 0 : i64, scratch_operands = 0 : i64, tpu.core_type = #tpu.core_type<tc>, window_params = [{transform_indices = @transform_0, window_bounds = array<i64: 1, 8, 32>}, {transform_indices = @transform_1, window_bounds = array<i64: 1, 8, 32>}, {transform_indices = @transform_2, window_bounds = array<i64: 1, 8, 32>}, {transform_indices = @transform_3, window_bounds = array<i64: 1, 8, 32>}, {transform_indices = @transform_4, window_bounds = array<i64: 1, 8, 32>}, {transform_indices = @transform_5, window_bounds = array<i64: 1, 8, 32>}]} {
    %c0 = arith.constant 0 : index
    %c0_0 = arith.constant 0 : index
    %c0_1 = arith.constant 0 : index
    %0 = vector.load %arg1[%c0, %c0_0, %c0_1] : memref<1x8x32xf32, #tpu.memory_space<vmem>>, vector<1x8x32xf32>
    %1 = vector.shape_cast %0 : vector<1x8x32xf32> to vector<8x32xf32>
    %c0_2 = arith.constant 0 : index
    %c0_3 = arith.constant 0 : index
    %c0_4 = arith.constant 0 : index
    %2 = vector.load %arg2[%c0_2, %c0_3, %c0_4] : memref<1x8x32xf32, #tpu.memory_space<vmem>>, vector<1x8x32xf32>
    %3 = vector.shape_cast %2 : vector<1x8x32xf32> to vector<8x32xf32>
    %c0_5 = arith.constant 0 : index
    %c0_6 = arith.constant 0 : index
    %c0_7 = arith.constant 0 : index
    %4 = vector.load %arg3[%c0_5, %c0_6, %c0_7] : memref<1x8x32xf32, #tpu.memory_space<vmem>>, vector<1x8x32xf32>
    %5 = vector.shape_cast %4 : vector<1x8x32xf32> to vector<8x32xf32>
    %c0_8 = arith.constant 0 : index
    %c0_9 = arith.constant 0 : index
    %c0_10 = arith.constant 0 : index
    %6 = vector.load %arg4[%c0_8, %c0_9, %c0_10] : memref<1x8x32xf32, #tpu.memory_space<vmem>>, vector<1x8x32xf32>
    %7 = vector.shape_cast %6 : vector<1x8x32xf32> to vector<8x32xf32>
    %8 = tpu.iota {dimensions = array<i32: 0>} : vector<8x8xi32>
    %9 = tpu.iota {dimensions = array<i32: 1>} : vector<8x8xi32>
    %10 = arith.cmpi slt, %9, %8 : vector<8x8xi32>
    %cst = arith.constant 0.353553385 : f32
    %11 = vector.broadcast %cst : f32 to vector<8x32xf32>
    %12 = arith.mulf %1, %11 : vector<8x32xf32>
    %13 = arith.truncf %12 : vector<8x32xf32> to vector<8x32xbf16>
    %14 = arith.truncf %3 : vector<8x32xf32> to vector<8x32xbf16>
    %15 = arith.truncf %5 : vector<8x32xf32> to vector<8x32xbf16>
    %16 = arith.truncf %7 : vector<8x32xf32> to vector<8x32xbf16>
    %17 = vector.extract_strided_slice %13 {offsets = [0, 0], sizes = [8, 8], strides = [1, 1]} : vector<8x32xbf16> to vector<8x8xbf16>
    %18 = vector.extract_strided_slice %14 {offsets = [0, 0], sizes = [8, 8], strides = [1, 1]} : vector<8x32xbf16> to vector<8x8xbf16>
    %cst_11 = arith.constant dense<0.000000e+00> : vector<8x8xf32>
    %19 = tpu.matmul %17, %18, %cst_11 {dimension_numbers = #tpu.dot_dimension_numbers<[1], [1], [0], [0], [0, 0, 1, 0], [], []>} : vector<8x8xbf16>, vector<8x8xbf16>, vector<8x8xf32> -> vector<8x8xf32>
    %cst_12 = arith.constant -1.000000e+09 : f32
    %20 = vector.broadcast %cst_12 : f32 to vector<8x8xf32>
    %21 = arith.select %10, %19, %20 : vector<8x8xi1>, vector<8x8xf32>
    %cst_13 = arith.constant dense<0xFF800000> : vector<8xf32>
    %22 = vector.multi_reduction <maximumf>, %21, %cst_13 [1] : vector<8x8xf32> to vector<8xf32>
    %23 = vector.shape_cast %22 : vector<8xf32> to vector<8x1xf32>
    %24 = vector.broadcast %23 : vector<8x1xf32> to vector<8x8xf32>
    %25 = arith.subf %21, %24 : vector<8x8xf32>
    %26 = math.exp %25 : vector<8x8xf32>
    %cst_14 = arith.constant dense<0.000000e+00> : vector<8xf32>
    %27 = vector.multi_reduction <add>, %26, %cst_14 [1] : vector<8x8xf32> to vector<8xf32>
    %28 = vector.shape_cast %27 : vector<8xf32> to vector<8x1xf32>
    %29 = tpu.reciprocal %28 {approx = true} : vector<8x1xf32> -> vector<8x1xf32>
    %30 = vector.broadcast %29 : vector<8x1xf32> to vector<8x8xf32>
    %31 = arith.mulf %26, %30 : vector<8x8xf32>
    %32 = vector.extract_strided_slice %15 {offsets = [0, 0], sizes = [8, 8], strides = [1, 1]} : vector<8x32xbf16> to vector<8x8xbf16>
    %33 = vector.extract_strided_slice %16 {offsets = [0, 0], sizes = [8, 8], strides = [1, 1]} : vector<8x32xbf16> to vector<8x8xbf16>
    %34 = tpu.concatenate %32, %33 in 1 : vector<8x8xbf16>, vector<8x8xbf16> -> vector<8x16xbf16>
    %35 = arith.truncf %31 : vector<8x8xf32> to vector<8x8xbf16>
    %cst_15 = arith.constant dense<0.000000e+00> : vector<8x16xf32>
    %36 = tpu.matmul %35, %34, %cst_15 {dimension_numbers = #tpu.dot_dimension_numbers<[1], [0], [0], [1], [0, 0, 1, 1], [], []>} : vector<8x8xbf16>, vector<8x16xbf16>, vector<8x16xf32> -> vector<8x16xf32>
    %37 = vector.extract_strided_slice %36 {offsets = [0, 0], sizes = [8, 8], strides = [1, 1]} : vector<8x16xf32> to vector<8x8xf32>
    %38 = vector.extract_strided_slice %36 {offsets = [0, 8], sizes = [8, 8], strides = [1, 1]} : vector<8x16xf32> to vector<8x8xf32>
    %39 = vector.extract_strided_slice %13 {offsets = [0, 8], sizes = [8, 8], strides = [1, 1]} : vector<8x32xbf16> to vector<8x8xbf16>
    %40 = vector.extract_strided_slice %14 {offsets = [0, 8], sizes = [8, 8], strides = [1, 1]} : vector<8x32xbf16> to vector<8x8xbf16>
    %cst_16 = arith.constant dense<0.000000e+00> : vector<8x8xf32>
    %41 = tpu.matmul %39, %40, %cst_16 {dimension_numbers = #tpu.dot_dimension_numbers<[1], [1], [0], [0], [0, 0, 1, 0], [], []>} : vector<8x8xbf16>, vector<8x8xbf16>, vector<8x8xf32> -> vector<8x8xf32>
    %cst_17 = arith.constant -1.000000e+09 : f32
    %42 = vector.broadcast %cst_17 : f32 to vector<8x8xf32>
    %43 = arith.select %10, %41, %42 : vector<8x8xi1>, vector<8x8xf32>
    %cst_18 = arith.constant dense<0xFF800000> : vector<8xf32>
    %44 = vector.multi_reduction <maximumf>, %43, %cst_18 [1] : vector<8x8xf32> to vector<8xf32>
    %45 = vector.shape_cast %44 : vector<8xf32> to vector<8x1xf32>
    %46 = vector.broadcast %45 : vector<8x1xf32> to vector<8x8xf32>
    %47 = arith.subf %43, %46 : vector<8x8xf32>
    %48 = math.exp %47 : vector<8x8xf32>
    %cst_19 = arith.constant dense<0.000000e+00> : vector<8xf32>
    %49 = vector.multi_reduction <add>, %48, %cst_19 [1] : vector<8x8xf32> to vector<8xf32>
    %50 = vector.shape_cast %49 : vector<8xf32> to vector<8x1xf32>
    %51 = tpu.reciprocal %50 {approx = true} : vector<8x1xf32> -> vector<8x1xf32>
    %52 = vector.broadcast %51 : vector<8x1xf32> to vector<8x8xf32>
    %53 = arith.mulf %48, %52 : vector<8x8xf32>
    %54 = vector.extract_strided_slice %15 {offsets = [0, 8], sizes = [8, 8], strides = [1, 1]} : vector<8x32xbf16> to vector<8x8xbf16>
    %55 = vector.extract_strided_slice %16 {offsets = [0, 8], sizes = [8, 8], strides = [1, 1]} : vector<8x32xbf16> to vector<8x8xbf16>
    %56 = tpu.concatenate %54, %55 in 1 : vector<8x8xbf16>, vector<8x8xbf16> -> vector<8x16xbf16>
    %57 = arith.truncf %53 : vector<8x8xf32> to vector<8x8xbf16>
    %cst_20 = arith.constant dense<0.000000e+00> : vector<8x16xf32>
    %58 = tpu.matmul %57, %56, %cst_20 {dimension_numbers = #tpu.dot_dimension_numbers<[1], [0], [0], [1], [0, 0, 1, 1], [], []>} : vector<8x8xbf16>, vector<8x16xbf16>, vector<8x16xf32> -> vector<8x16xf32>
    %59 = vector.extract_strided_slice %58 {offsets = [0, 0], sizes = [8, 8], strides = [1, 1]} : vector<8x16xf32> to vector<8x8xf32>
    %60 = vector.extract_strided_slice %58 {offsets = [0, 8], sizes = [8, 8], strides = [1, 1]} : vector<8x16xf32> to vector<8x8xf32>
    %61 = vector.extract_strided_slice %13 {offsets = [0, 16], sizes = [8, 8], strides = [1, 1]} : vector<8x32xbf16> to vector<8x8xbf16>
    %62 = vector.extract_strided_slice %14 {offsets = [0, 16], sizes = [8, 8], strides = [1, 1]} : vector<8x32xbf16> to vector<8x8xbf16>
    %cst_21 = arith.constant dense<0.000000e+00> : vector<8x8xf32>
    %63 = tpu.matmul %61, %62, %cst_21 {dimension_numbers = #tpu.dot_dimension_numbers<[1], [1], [0], [0], [0, 0, 1, 0], [], []>} : vector<8x8xbf16>, vector<8x8xbf16>, vector<8x8xf32> -> vector<8x8xf32>
    %cst_22 = arith.constant -1.000000e+09 : f32
    %64 = vector.broadcast %cst_22 : f32 to vector<8x8xf32>
    %65 = arith.select %10, %63, %64 : vector<8x8xi1>, vector<8x8xf32>
    %cst_23 = arith.constant dense<0xFF800000> : vector<8xf32>
    %66 = vector.multi_reduction <maximumf>, %65, %cst_23 [1] : vector<8x8xf32> to vector<8xf32>
    %67 = vector.shape_cast %66 : vector<8xf32> to vector<8x1xf32>
    %68 = vector.broadcast %67 : vector<8x1xf32> to vector<8x8xf32>
    %69 = arith.subf %65, %68 : vector<8x8xf32>
    %70 = math.exp %69 : vector<8x8xf32>
    %cst_24 = arith.constant dense<0.000000e+00> : vector<8xf32>
    %71 = vector.multi_reduction <add>, %70, %cst_24 [1] : vector<8x8xf32> to vector<8xf32>
    %72 = vector.shape_cast %71 : vector<8xf32> to vector<8x1xf32>
    %73 = tpu.reciprocal %72 {approx = true} : vector<8x1xf32> -> vector<8x1xf32>
    %74 = vector.broadcast %73 : vector<8x1xf32> to vector<8x8xf32>
    %75 = arith.mulf %70, %74 : vector<8x8xf32>
    %76 = vector.extract_strided_slice %15 {offsets = [0, 16], sizes = [8, 8], strides = [1, 1]} : vector<8x32xbf16> to vector<8x8xbf16>
    %77 = vector.extract_strided_slice %16 {offsets = [0, 16], sizes = [8, 8], strides = [1, 1]} : vector<8x32xbf16> to vector<8x8xbf16>
    %78 = tpu.concatenate %76, %77 in 1 : vector<8x8xbf16>, vector<8x8xbf16> -> vector<8x16xbf16>
    %79 = arith.truncf %75 : vector<8x8xf32> to vector<8x8xbf16>
    %cst_25 = arith.constant dense<0.000000e+00> : vector<8x16xf32>
    %80 = tpu.matmul %79, %78, %cst_25 {dimension_numbers = #tpu.dot_dimension_numbers<[1], [0], [0], [1], [0, 0, 1, 1], [], []>} : vector<8x8xbf16>, vector<8x16xbf16>, vector<8x16xf32> -> vector<8x16xf32>
    %81 = vector.extract_strided_slice %80 {offsets = [0, 0], sizes = [8, 8], strides = [1, 1]} : vector<8x16xf32> to vector<8x8xf32>
    %82 = vector.extract_strided_slice %80 {offsets = [0, 8], sizes = [8, 8], strides = [1, 1]} : vector<8x16xf32> to vector<8x8xf32>
    %83 = vector.extract_strided_slice %13 {offsets = [0, 24], sizes = [8, 8], strides = [1, 1]} : vector<8x32xbf16> to vector<8x8xbf16>
    %84 = vector.extract_strided_slice %14 {offsets = [0, 24], sizes = [8, 8], strides = [1, 1]} : vector<8x32xbf16> to vector<8x8xbf16>
    %cst_26 = arith.constant dense<0.000000e+00> : vector<8x8xf32>
    %85 = tpu.matmul %83, %84, %cst_26 {dimension_numbers = #tpu.dot_dimension_numbers<[1], [1], [0], [0], [0, 0, 1, 0], [], []>} : vector<8x8xbf16>, vector<8x8xbf16>, vector<8x8xf32> -> vector<8x8xf32>
    %cst_27 = arith.constant -1.000000e+09 : f32
    %86 = vector.broadcast %cst_27 : f32 to vector<8x8xf32>
    %87 = arith.select %10, %85, %86 : vector<8x8xi1>, vector<8x8xf32>
    %cst_28 = arith.constant dense<0xFF800000> : vector<8xf32>
    %88 = vector.multi_reduction <maximumf>, %87, %cst_28 [1] : vector<8x8xf32> to vector<8xf32>
    %89 = vector.shape_cast %88 : vector<8xf32> to vector<8x1xf32>
    %90 = vector.broadcast %89 : vector<8x1xf32> to vector<8x8xf32>
    %91 = arith.subf %87, %90 : vector<8x8xf32>
    %92 = math.exp %91 : vector<8x8xf32>
    %cst_29 = arith.constant dense<0.000000e+00> : vector<8xf32>
    %93 = vector.multi_reduction <add>, %92, %cst_29 [1] : vector<8x8xf32> to vector<8xf32>
    %94 = vector.shape_cast %93 : vector<8xf32> to vector<8x1xf32>
    %95 = tpu.reciprocal %94 {approx = true} : vector<8x1xf32> -> vector<8x1xf32>
    %96 = vector.broadcast %95 : vector<8x1xf32> to vector<8x8xf32>
    %97 = arith.mulf %92, %96 : vector<8x8xf32>
    %98 = vector.extract_strided_slice %15 {offsets = [0, 24], sizes = [8, 8], strides = [1, 1]} : vector<8x32xbf16> to vector<8x8xbf16>
    %99 = vector.extract_strided_slice %16 {offsets = [0, 24], sizes = [8, 8], strides = [1, 1]} : vector<8x32xbf16> to vector<8x8xbf16>
    %100 = tpu.concatenate %98, %99 in 1 : vector<8x8xbf16>, vector<8x8xbf16> -> vector<8x16xbf16>
    %101 = arith.truncf %97 : vector<8x8xf32> to vector<8x8xbf16>
    %cst_30 = arith.constant dense<0.000000e+00> : vector<8x16xf32>
    %102 = tpu.matmul %101, %100, %cst_30 {dimension_numbers = #tpu.dot_dimension_numbers<[1], [0], [0], [1], [0, 0, 1, 1], [], []>} : vector<8x8xbf16>, vector<8x16xbf16>, vector<8x16xf32> -> vector<8x16xf32>
    %103 = vector.extract_strided_slice %102 {offsets = [0, 0], sizes = [8, 8], strides = [1, 1]} : vector<8x16xf32> to vector<8x8xf32>
    %104 = vector.extract_strided_slice %102 {offsets = [0, 8], sizes = [8, 8], strides = [1, 1]} : vector<8x16xf32> to vector<8x8xf32>
    %105 = tpu.concatenate %37, %59, %81, %103 in 1 : vector<8x8xf32>, vector<8x8xf32>, vector<8x8xf32>, vector<8x8xf32> -> vector<8x32xf32>
    %c0_31 = arith.constant 0 : index
    %c0_32 = arith.constant 0 : index
    %c0_33 = arith.constant 0 : index
    %106 = vector.load %arg5[%c0_31, %c0_32, %c0_33] : memref<1x8x32xf32, #tpu.memory_space<vmem>>, vector<1x8x32xf32>
    %107 = vector.shape_cast %106 : vector<1x8x32xf32> to vector<8x32xf32>
    %108 = vector.shape_cast %105 : vector<8x32xf32> to vector<1x8x32xf32>
    tpu.vector_store %arg5[%c0_31, %c0_32, %c0_33], %108 {strides = array<i32>} : memref<1x8x32xf32, #tpu.memory_space<vmem>>, vector<1x8x32xf32>,
    %109 = tpu.concatenate %38, %60, %82, %104 in 1 : vector<8x8xf32>, vector<8x8xf32>, vector<8x8xf32>, vector<8x8xf32> -> vector<8x32xf32>
    %c0_34 = arith.constant 0 : index
    %c0_35 = arith.constant 0 : index
    %c0_36 = arith.constant 0 : index
    %110 = vector.load %arg6[%c0_34, %c0_35, %c0_36] : memref<1x8x32xf32, #tpu.memory_space<vmem>>, vector<1x8x32xf32>
    %111 = vector.shape_cast %110 : vector<1x8x32xf32> to vector<8x32xf32>
    %112 = vector.shape_cast %109 : vector<8x32xf32> to vector<1x8x32xf32>
    tpu.vector_store %arg6[%c0_34, %c0_35, %c0_36], %112 {strides = array<i32>} : memref<1x8x32xf32, #tpu.memory_space<vmem>>, vector<1x8x32xf32>,
    return
  }
  func.func @transform_0(%arg0: i32) -> (i32, i32, i32) {
    %c0_i32 = arith.constant 0 : i32
    %c0_i32_0 = arith.constant 0 : i32
    %c0_i32_1 = arith.constant 0 : i32
    return %arg0, %c0_i32, %c0_i32_0 : i32, i32, i32
  }
  func.func @transform_1(%arg0: i32) -> (i32, i32, i32) {
    %c0_i32 = arith.constant 0 : i32
    %c0_i32_0 = arith.constant 0 : i32
    %c0_i32_1 = arith.constant 0 : i32
    return %arg0, %c0_i32, %c0_i32_0 : i32, i32, i32
  }
  func.func @transform_2(%arg0: i32) -> (i32, i32, i32) {
    %c0_i32 = arith.constant 0 : i32
    %c0_i32_0 = arith.constant 0 : i32
    %c0_i32_1 = arith.constant 0 : i32
    return %arg0, %c0_i32, %c0_i32_0 : i32, i32, i32
  }
  func.func @transform_3(%arg0: i32) -> (i32, i32, i32) {
    %c0_i32 = arith.constant 0 : i32
    %c0_i32_0 = arith.constant 0 : i32
    %c0_i32_1 = arith.constant 0 : i32
    return %arg0, %c0_i32, %c0_i32_0 : i32, i32, i32
  }
  func.func @transform_4(%arg0: i32) -> (i32, i32, i32) {
    %c0_i32 = arith.constant 0 : i32
    %c0_i32_0 = arith.constant 0 : i32
    %c0_i32_1 = arith.constant 0 : i32
    return %arg0, %c0_i32, %c0_i32_0 : i32, i32, i32
  }
  func.func @transform_5(%arg0: i32) -> (i32, i32, i32) {
    %c0_i32 = arith.constant 0 : i32
    %c0_i32_0 = arith.constant 0 : i32
    %c0_i32_1 = arith.constant 0 : i32
    return %arg0, %c0_i32, %c0_i32_0 : i32, i32, i32
  }
}

</mosaic_0001>

<bundles_post_ra>
// kernel: tpu_custom_call.1
= control target key start
LH: loop header
LB: loop body
LE: loop exit
PB: predicated region body
PF: predicated region fallthrough
CT: control target
= control target key end

     0   :  { %s1926_s0 = inlined_call_operand.hbm [shape: f32[2,8,32], index: 0, kind: input, shape index: {}]   ;;  %s1927_s1 = inlined_call_operand.hbm [shape: f32[2,8,32], index: 1, kind: input, shape index: {}]   ;;  %s1928_s2 = inlined_call_operand.hbm [shape: f32[2,8,32], index: 2, kind: input, shape index: {}]   ;;  %s1929_s3 = inlined_call_operand.hbm [shape: f32[2,8,32], index: 3, kind: input, shape index: {}]   ;;  %s1930_s4 = inlined_call_operand.hbm [shape: f32[2,8,32], index: 4, kind: output, shape index: {0}]   ;;  %s1931_s5 = inlined_call_operand.hbm [shape: f32[2,8,32], index: 5, kind: output, shape index: {1}]  }
   0x1   :  { %1939 = sst [smem:[#allocation21_spill]] %s1927_s1 }
   0x2   :  { %11 = vsyncpa [#allocation3], 0 }
   0x3   :  { %13 = vsyncpa [#allocation3 + $0x1], 0 }
   0x4   :  { %14 = vsyncpa [#allocation6], 0 }
   0x5   :  { %16 = vsyncpa [#allocation6 + $0x1], 0 }
   0x6   :  { %17 = vsyncpa [#allocation9], 0 }
   0x7   :  { %19 = vsyncpa [#allocation9 + $0x1], 0 }
   0x8   :  { %20 = vsyncpa [#allocation4], 0 }
   0x9   :  { %22 = vsyncpa [#allocation4 + $0x1], 0 }
   0xa   :  { %23 = vsyncpa [#allocation12], 0 }
   0xb   :  { %25 = vsyncpa [#allocation12 + $0x1], 0  ;;  %s1523_s18 = smov 0   ;;  %s1525_s19 = smov 0  }
   0xc   :  { %s1527_s20 = smov 0   ;;  %s1529_s21 = smov 0  }
   0xd LB: > { %1940 = sst [smem:[#allocation18_spill]] %s1473_s20  ;;  %s1544_s22 = sadd.s32 4294967295, %s1477_s21   ;;  %s1477_s21 = sphi %s1529_s21, %s1959_s21   ;;  %s1473_s20 = sphi %s1527_s20, %s1961_s20   ;;  %s1469_s19 = sphi %s1525_s19, %s1963_s19   ;;  %s1465_s18 = sphi %s1523_s18, %s1962_s18  }
   0xe   : > { %s1065_s23 = sadd.s32 4294967294, %s1477_s21   ;;  %s1548_s24 = sadd.s32 1, %s1477_s21  }
   0xf   : > { %1941 = sst [smem:[#allocation19_spill]] %s1548_s24  ;;  %s38_s25 = sadd.s32 1, %s1473_s20 }
  0x10   : > { %s35_s26 = ssub.s32 %s1477_s21, %s1548_s24  ;;  %p45_p0 = scmp.ne.s32.totalorder %s1473_s20, %s1469_s19 }
  0x11   : > { %p36_p1 = scmp.eq.s32.totalorder %s35_s26, 0  ;;  %p46_p2 = scmp.eq.s32.totalorder %s1477_s21, 0 }
  0x12   : > { %p51_p3 = scmp.ne.s32.totalorder %s1469_s19, %s1465_s18  ;;  %p52_p4 = scmp.eq.s32.totalorder %s1544_s22, 0 }
  0x13   : > { %s1560_s27 = scalar_select %p36_p1, %s1473_s20, %s38_s25  }
  0x14   : > { %p47_p5 = por %p46_p2, %p45_p0  ;;  %p1562_p6 = por %p52_p4, %p51_p3 }
  0x15   : > { %1942 = sst [smem:[#allocation20_spill]] %s1560_s27  ;;  %p153_p7 = scmp.eq.s32.totalorder %s1544_s22, 1 }
  0x16   : > { %s1943_s28 = scalar_select %p1562_p6, 1, 0 }
  0x17   : > { %p159_p8 = scmp.eq.s32.totalorder %s1065_s23, 1  ;;  %p1193_p10 = scmp.lt.s32.totalorder %s1477_s21, 2 }
  0x18   : > { %p1569_p11 = por %p153_p7, %p45_p0  ;;  %s1578_s6 = sand.u32 1, %s1473_s20  }
  0x19   : > { %p1573_p12 = por %p159_p8, %p51_p3  ;;  %s1581_s7 = sshll.u32 %s1477_s21, 7 }
  0x1a   : > { %s1944_s29 = scalar_select %p1569_p11, 1, 0 }
  0x1b   : > { %s1945_s30 = scalar_select %p1573_p12, 1, 0 }
  0x1c   : > { %s1584_s8 = sshll.u32 %s1578_s6, 3  ;;  %p1586_p13 = pnand %p1193_p10, %p47_p5 }
  0x1d   : > { %s223_s10 = sand.u32 1, %s1477_s21   ;;  %s1947_s1 = sld [smem:[#allocation21_spill]] }
  0x1e   : > { %s1946_s9 = scalar_select %p1586_p13, 1, 0 }
  0x1f   : > { %s227_s14 = scalar_lea.vmem [#allocation5], %s1584_s8  ;;  %s1601_s16 = scalar_lea.sflag [#allocation6], %s223_s10 }
  0x20   : > { %s234_s15 = sshll.u32 %s227_s14, 4  ;;  %p1607_p2 = pneg %p1586_p13  ;;  %s1598_s15 = int_to_ptr.vmem [resolvable:$true] %s234_s15 }
  0x23   : > { %s1595_s13 = scalar_lea.hbm %s1947_s1, %s1581_s7  ;;  %s1256_s11 = scalar_lea.hbm %s1947_s1, 256 }
  0x24   : > { %s1251_s17 = scalar_lea.hbm %s1595_s13, 128  ;;  %p1257_p5 = scmp.lt.u32.totalorder %s1595_s13, %s1947_s1 }
  0x25   : > { %p1252_p1 = scmp.ne.s32.totalorder %s1595_s13, %s1251_s17  ;;  %p1258_p7 = scmp.lt.u32.totalorder %s1256_s11, %s1251_s17 }
  0x26   : > { %p1260_p10 = scmp.lt.u32.totalorder %s1251_s17, %s1595_s13 }
  0x27   : > { %p1254_p3 = pnand %p1607_p2, %p1252_p1  ;;  %p1259_p8 = por %p1258_p7, %p1257_p5 }
  0x29   : > { %p1255_p4 = pneg %p1254_p3  ;;  %p1261_p9 = por %p1260_p10, %p1259_p8 }
  0x2b   : > { %p1262_p0 = pnand %p1261_p9, %p1255_p4 }
  0x2d   : > { %1265 = shalt.err (!%p1262_p0)
}
  0x2e   : > { %s1266_s10 = scalar_lea.vmem %s1598_s15, 128  ;;  %s1479_s25 = smov [#allocation5]  }
  0x2f   : > { %p1267_p1 = scmp.ne.s32.totalorder %s1598_s15, %s1266_s10  ;;  %s1271_s26 = sshll.u32 %s1479_s25, 4  ;;  %s1272_s26 = int_to_ptr.vmem [resolvable:$false] %s1271_s26 }
  0x30   : > { %s1273_s12 = scalar_lea.vmem %s1272_s26, 256  ;;  %p1274_p11 = scmp.lt.s32.totalorder %s1598_s15, %s1272_s26 }
  0x31   : > { %p1269_p3 = pnand %p1267_p1, %p1607_p2  ;;  %p1275_p6 = scmp.lt.s32.totalorder %s1273_s12, %s1266_s10 }
  0x33   : > { %p1270_p12 = pneg %p1269_p3  ;;  %p1276_p5 = por %p1275_p6, %p1274_p11 }
  0x35   : > { %p1277_p7 = pnand %p1276_p5, %p1270_p12 }
  0x37   : > { %1280 = shalt.err (!%p1277_p7)
}
  0x38   : > { %1179 = dma.hbm_to_vmem [thread:$0]  (!%p1586_p13), %s1595_s13, 128, %s1598_s15, %s1601_s16  }
  0x39   : > { %p275_p9 = scmp.lt.s32.totalorder %s1477_s21, 3  ;;  %s1636_s14 = scalar_lea.hbm %s1926_s0, %s1581_s7 }
  0x3a   : > { %p1949_p6 = scmp.ge.s32.totalorder %s1477_s21, 1  ;;  %s209_s25 = scalar_lea.vmem [#allocation2], %s1584_s8 }
  0x3b   : > { %s216_s26 = sshll.u32 %s209_s25, 4  ;;  %s206_s12 = scalar_lea.sflag [#allocation3], %s1578_s6  ;;  %s217_s26 = int_to_ptr.vmem [resolvable:$true] %s216_s26 }
  0x3c   : > { %p1640_p11 = pnand %p1949_p6, %p275_p9  ;;  %s1281_s13 = scalar_lea.hbm %s1636_s14, 128 }
  0x3d   : > { %p1282_p12 = scmp.ne.s32.totalorder %s1636_s14, %s1281_s13  ;;  %s1286_s11 = scalar_lea.hbm %s1926_s0, 256 }
  0x3e   : > { %s1950_s10 = scalar_select %p1640_p11, 1, 0 }
  0x3f   : > { %p1284_p0 = pnand %p1282_p12, %p1607_p2  ;;  %p1287_p8 = scmp.lt.u32.totalorder %s1636_s14, %s1926_s0 }
  0x40   : > { %p1288_p10 = scmp.lt.u32.totalorder %s1286_s11, %s1281_s13  ;;  %p1290_p3 = scmp.lt.u32.totalorder %s1281_s13, %s1636_s14 }
  0x41   : > { %p1285_p4 = pneg %p1284_p0 }
  0x42   : > { %p1289_p1 = por %p1288_p10, %p1287_p8 }
  0x44   : > { %p1291_p5 = por %p1290_p3, %p1289_p1 }
  0x46   : > { %p1292_p7 = pnand %p1291_p5, %p1285_p4 }
  0x48   : > { %1295 = shalt.err (!%p1292_p7)
}
  0x49   : > { %s1296_s25 = scalar_lea.vmem %s217_s26, 128  ;;  %s1480_s20 = smov [#allocation2]  }
  0x4a   : > { %p1297_p9 = scmp.ne.s32.totalorder %s217_s26, %s1296_s25  ;;  %s1301_s24 = sshll.u32 %s1480_s20, 4  ;;  %s1302_s24 = int_to_ptr.vmem [resolvable:$false] %s1301_s24 }
  0x4b   : > { %s1303_s15 = scalar_lea.vmem %s1302_s24, 256  ;;  %p1304_p0 = scmp.lt.s32.totalorder %s217_s26, %s1302_s24 }
  0x4c   : > { %p1299_p6 = pnand %p1297_p9, %p1607_p2  ;;  %p1305_p11 = scmp.lt.s32.totalorder %s1303_s15, %s1296_s25 }
  0x4e   : > { %p1300_p12 = pneg %p1299_p6  ;;  %p1306_p13 = por %p1305_p11, %p1304_p0 }
  0x50   : > { %p1307_p8 = pnand %p1306_p13, %p1300_p12 }
  0x52   : > { %1310 = shalt.err (!%p1307_p8)
}
  0x53   : > { %p1951_p10 = scmp.ne.s32.totalorder %s1946_s9, 0  ;;  %s1667_s13 = scalar_lea.hbm %s1928_s2, %s1581_s7 }
  0x54   : > { %s245_s20 = scalar_lea.vmem [#allocation7], %s1584_s8  ;;  %s1311_s17 = scalar_lea.hbm %s1667_s13, 128 }
  0x55   : > { %1176 = dma.hbm_to_vmem [thread:$0]  (!%p1951_p10), %s1636_s14, 128, %s217_s26, %s206_s12  }
  0x56   : > { %s252_s24 = sshll.u32 %s245_s20, 4  ;;  %p1312_p13 = scmp.ne.s32.totalorder %s1667_s13, %s1311_s17  ;;  %s253_s24 = int_to_ptr.vmem [resolvable:$true] %s252_s24 }
  0x57   : > { %s1316_s14 = scalar_lea.hbm %s1928_s2, 256  ;;  %p1317_p1 = scmp.lt.u32.totalorder %s1667_s13, %s1928_s2 }
  0x58   : > { %p1314_p11 = pnand %p1312_p13, %p1607_p2  ;;  %p1318_p3 = scmp.lt.u32.totalorder %s1316_s14, %s1311_s17 }
  0x59   : > { %p1320_p7 = scmp.lt.u32.totalorder %s1311_s17, %s1667_s13 }
  0x5a   : > { %p1315_p4 = pneg %p1314_p11  ;;  %p1319_p5 = por %p1318_p3, %p1317_p1 }
  0x5c   : > { %p1321_p9 = por %p1320_p7, %p1319_p5 }
  0x5e   : > { %p1322_p6 = pnand %p1321_p9, %p1315_p4 }
  0x60   : > { %1325 = shalt.err (!%p1322_p6)
}
  0x61   : > { %s1326_s15 = scalar_lea.vmem %s253_s24, 128  ;;  %s1481_s1 = smov [#allocation7]  }
  0x62   : > { %p1327_p12 = scmp.ne.s32.totalorder %s253_s24, %s1326_s15  ;;  %s1331_s27 = sshll.u32 %s1481_s1, 4  ;;  %s1332_s27 = int_to_ptr.vmem [resolvable:$false] %s1331_s27 }
  0x63   : > { %s1333_s20 = scalar_lea.vmem %s1332_s27, 256  ;;  %p1334_p13 = scmp.lt.s32.totalorder %s253_s24, %s1332_s27 }
  0x64   : > { %p1329_p0 = pnand %p1327_p12, %p1607_p2  ;;  %p1335_p11 = scmp.lt.s32.totalorder %s1333_s20, %s1326_s15 }
  0x66   : > { %p1330_p8 = pneg %p1329_p0  ;;  %p1336_p10 = por %p1335_p11, %p1334_p13 }
  0x68   : > { %p1337_p1 = pnand %p1336_p10, %p1330_p8 }
  0x6a   : > { %1340 = shalt.err (!%p1337_p1)
}
  0x6b   : > { %p1952_p3 = scmp.ne.s32.totalorder %s1946_s9, 0  ;;  %s1692_s25 = scalar_lea.hbm %s1929_s3, %s1581_s7 }
  0x6c   : > { %s263_s14 = scalar_lea.vmem [#allocation8], %s1584_s8  ;;  %s260_s12 = scalar_lea.sflag [#allocation9], %s1578_s6 }
  0x6d   : > { %1182 = dma.hbm_to_vmem [thread:$0]  (!%p1952_p3), %s1667_s13, 128, %s253_s24, %s1601_s16  }
  0x6e   : > { %s270_s26 = sshll.u32 %s263_s14, 4  ;;  %s1341_s15 = scalar_lea.hbm %s1692_s25, 128  ;;  %s271_s26 = int_to_ptr.vmem [resolvable:$true] %s270_s26 }
  0x6f   : > { %p1342_p10 = scmp.ne.s32.totalorder %s1692_s25, %s1341_s15  ;;  %s1346_s13 = scalar_lea.hbm %s1929_s3, 256 }
  0x70   : > { %p1347_p7 = scmp.lt.u32.totalorder %s1692_s25, %s1929_s3  ;;  %p1348_p9 = scmp.lt.u32.totalorder %s1346_s13, %s1341_s15 }
  0x71   : > { %p1344_p4 = pnand %p1342_p10, %p1607_p2  ;;  %p1350_p12 = scmp.lt.u32.totalorder %s1341_s15, %s1692_s25 }
  0x72   : > { %p1349_p6 = por %p1348_p9, %p1347_p7 }
  0x73   : > { %p1345_p5 = pneg %p1344_p4 }
  0x74   : > { %p1351_p0 = por %p1350_p12, %p1349_p6 }
  0x76   : > { %p1352_p8 = pnand %p1351_p0, %p1345_p5 }
  0x78   : > { %1355 = shalt.err (!%p1352_p8)
}
  0x79   : > { %s1356_s6 = scalar_lea.vmem %s271_s26, 128  ;;  %s1482_s8 = smov [#allocation8]  }
  0x7a   : > { %p1357_p13 = scmp.ne.s32.totalorder %s271_s26, %s1356_s6  ;;  %s1361_s27 = sshll.u32 %s1482_s8, 4  ;;  %s1362_s27 = int_to_ptr.vmem [resolvable:$false] %s1361_s27 }
  0x7b   : > { %s1363_s20 = scalar_lea.vmem %s1362_s27, 256  ;;  %p1364_p10 = scmp.lt.s32.totalorder %s271_s26, %s1362_s27 }
  0x7c   : > { %p1359_p11 = pnand %p1357_p13, %p1607_p2  ;;  %p1365_p4 = scmp.lt.s32.totalorder %s1363_s20, %s1356_s6 }
  0x7e   : > { %p1360_p1 = pneg %p1359_p11  ;;  %p1366_p3 = por %p1365_p4, %p1364_p10 }
  0x80   : > { %p1367_p7 = pnand %p1366_p3, %p1360_p1 }
  0x82   : > { %1370 = shalt.err (!%p1367_p7)
}
  0x83   : > { %p1953_p9 = scmp.ne.s32.totalorder %s1946_s9, 0  ;;  %p1954_p5 = scmp.ne.s32.totalorder %s1950_s10, 0 }
  0x84   : > { %s1716_s23 = sand.u32 (!%p1954_p5), 1, %s1469_s19   ;;  %p1955_p2 = scmp.ne.s32.totalorder (!%p1954_p5), %s1943_s28, 0 }
  0x85   : > { %1185 = dma.hbm_to_vmem [thread:$0]  (!%p1953_p9), %s1692_s25, 128, %s271_s26, %s260_s12  }
  0x86   : > { %279 = sbr.rel (%p1954_p5) target bundleno = 1643 (0x66b), region = 36  ;;  %s1719_s17 = sshll.u32 (!%p1954_p5), %s1716_s23, 3 }
  0x87   : > { %s282_s11 = scalar_lea.sflag (!%p1954_p5), [#allocation3], %s1716_s23  ;;  %s285_s14 = scalar_lea.vmem (!%p1954_p5), [#allocation2], %s1719_s17 }
  0x8d   : > { %1444 = dma.done.wait (%p1955_p2), %s282_s11, 128  }
  0x8e   : > { %1446 = vsyncadd (%p1955_p2), %s282_s11, 4294967168  ;;  %s290_s9 = sand.u32 1, %s1544_s22   ;;  %s294_s25 = scalar_lea.vmem [#allocation5], %s1719_s17 }
  0x8f   : > { %s291_s10 = scalar_lea.sflag [#allocation6], %s290_s9 }
  0x90   : > { %1448 = dma.done.wait (%p1955_p2), %s291_s10, 256  }
  0x91   : > { %1450 = vsyncadd (%p1955_p2), %s291_s10, 4294967040  ;;  %s303_s26 = scalar_lea.vmem [#allocation7], %s1719_s17  ;;  %s309_s12 = scalar_lea.sflag [#allocation9], %s1716_s23 }
  0x92   : > { %s312_s15 = scalar_lea.vmem [#allocation8], %s1719_s17 }
  0x93   : > { %1452 = dma.done.wait (%p1955_p2), %s309_s12, 128  }
  0x94   : > { %1454 = vsyncadd (%p1955_p2), %s309_s12, 4294967168  ;;  %v1483_v0 = vmov 0.0   ;;  %vm1484_vm0 = vmmov 0   ;;  %v361_v1 = vld [vmem:[%s294_s25] sm:$0xff]  ;;  %vm374_vm1 = vcmask 64512   ;;  %v360_v2 = vld [vmem:[%s285_s14] sm:$0xff]  ;;  %v364_v7 = vlaneseq }
  0x95   : > { %1113 = vmatprep.subr.bf16.mxu0 %v1483_v0  ;;  %1115 = vmatprep.mubr.msk.bf16.mxu0 %vm1484_vm0, %v1483_v0  ;;  %v371_v3 = vpack.c.bf16 %v361_v1, %v361_v1  ;;  %v369_v5 = vmul.f32 0.35355338, %v360_v2  ;;  %v363_v16 = vld [vmem:[%s312_s15] sm:$0xff]  ;;  %s1485_s28 = smov 8   ;;  %s1486_s1 = smov 120   ;;  %v362_v24 = vld [vmem:[%s303_s26] sm:$0xff] }
  0x96   : > { %1119 = vmatprep.subr.bf16.mxu1 %v1483_v0  ;;  %1121 = vmatprep.mubr.msk.bf16.mxu1 %vm1484_vm0, %v1483_v0  ;;  %v1751_v8 = vshrl.u32 %v364_v7, 7  ;;  %v1753_v9 = vand.u32 127, %v364_v7  ;;  %v1763_v17 = vpack.c.bf16 %v363_v16, %v363_v16  ;;  %s1487_s16 = smov 112   ;;  %s1488_s13 = smov 104   ;;  %v1775_v25 = vpack.c.bf16 %v362_v24, %v362_v24 }
  0x97   : > { %v379_v4 = vsel %vm374_vm1, %v371_v3, 0  ;;  %v370_v6 = vpack.c.bf16 %v369_v5, %v369_v5  ;;  %vm443_vm3 = vcmask 1043456   ;;  %s1489_s24 = smov 16   ;;  %s1490_s7 = smov 24   ;;  %vm845_vm4 = vcmask 130048  }
  0x98   : > { %1114 = vmatpush3.bf16.xpose.msra.mxu0 %v379_v4  ;;  %vm368_vm2 = vcmp.lt.s32.totalorder %v1753_v9, %v1751_v8  ;;  %434 = vrot.lane.b32.xlu1 %v1763_v17, %s1485_s28  ;;  %s1093_s6 = sshll.u32 %s1544_s22, 7  ;;  %s351_s8 = scalar_lea.vmem [#allocation10], %s1719_s17  ;;  %vm847_vm5 = vcmask 195584   ;;  %vm849_vm6 = vcmask 261120  }
  0x99   : > { %1131 = vmatprep.subr.bf16.mxu0 %v1483_v0  ;;  %s884_s27 = sshll.u32 %s351_s8, 4  ;;  %s358_s20 = scalar_lea.vmem [#allocation11], %s1719_s17  ;;  %s1855_s27 = int_to_ptr.vmem [resolvable:$true] %s884_s27 }
  0x9a   : > { %s897_s11 = sshll.u32 %s358_s20, 4  ;;  %s1853_s10 = scalar_lea.hbm %s1930_s4, %s1093_s6  ;;  %s1862_s11 = int_to_ptr.vmem [resolvable:$true] %s897_s11 }
  0x9b   : > { %s1860_s25 = scalar_lea.hbm %s1931_s5, %s1093_s6  ;;  %s866_s26 = scalar_lea.sflag [#allocation4], %s1716_s23 }
  0x9c   : > { %490 = vrot.lane.b32.xlu1 %v371_v3, %s1486_s1  ;;  %s1371_s12 = scalar_lea.vmem %s1855_s27, 128  ;;  %p1956_p6 = scmp.ne.s32.totalorder %s1944_s29, 0 }
  0x9d   : > { %p1372_p3 = scmp.ne.s32.totalorder %s1855_s27, %s1371_s12  ;;  %s1491_s15 = smov [#allocation10]  }
  0x9f   : > { %1116 = vmatmul.mubr.msk.bf16.vlgmr.msra.gmra.mrb[0].mxu0 %vm374_vm1, %v370_v6  ;;  %p1373_p12 = pnand %p1372_p3, %p1956_p6 }
  0xa0   : > { %1133 = vmatprep.mubr.msk.bf16.mxu0 %vm1484_vm0, %v1483_v0  ;;  %604 = vrot.lane.b32.xlu1 %v371_v3, %s1487_s16 }
  0xa1   : > { %p1374_p0 = pneg %p1373_p12 }
  0xa4   : > { %602 = vrot.lane.b32.xlu1 %v370_v6, %s1487_s16 }
  0xa8   : > { %719 = vrot.lane.b32.xlu1 %v371_v3, %s1488_s13 }
  0xac   : > { %717 = vrot.lane.b32.xlu1 %v370_v6, %s1488_s13 }
 0x10a   : > { %v435_v23 = vpop.permute.xlu1 %434 }
 0x10b   : > { %v438_v26 = vsel %vm374_vm1, %v1775_v25, %v435_v23 }
 0x10c   : > { %v444_v27 = vsel %vm443_vm3, %v438_v26, 0 }
 0x10d   : > { %1120 = vmatpush3.bf16.msra.mxu1 %v444_v27 }
 0x10e   : > { %1125 = vmatprep.subr.bf16.mxu1 %v1483_v0  ;;  %v491_v30 = vpop.permute.xlu1 %490 }
 0x10f   : > { %v496_v32 = vsel %vm374_vm1, %v491_v30, 0 }
 0x112   : > { %v605_v34 = vpop.permute.xlu1 %604 }
 0x113   : > { %v610_v37 = vsel %vm374_vm1, %v605_v34, 0 }
 0x116   : > { %v603_v36 = vpop.permute.xlu1 %602 }
 0x11a   : > { %v720_v38 = vpop.permute.xlu1 %719 }
 0x11b   : > { %v725_v39 = vsel %vm374_vm1, %v720_v38, 0 }
 0x11e   : > { %v718_v40 = vpop.permute.xlu1 %717 }
 0x172   : > { %v415_v10 = vpop.f32.mrb[0].mxu0 }
 0x173   : > { %v421_v11 = vsel %vm368_vm2, %v415_v10, -1e+09  ;;  %v1117_v12 = vpop.f32.mrb[1].mxu0 }
 0x174   : > { %v418_v13 = vpop.f32.mrb[2].mxu0  ;;  %v422_v14 = vsel %vm374_vm1, %v421_v11, -inf }
 0x175   : > { %423 = vmax.xlane.f32.xlu0 %v422_v14  ;;  %v1118_v15 = vpop.f32.mrb[3].mxu0 }
 0x202   : > { %v424_v18 = vpop.xlane.xlu0 %423 }
 0x203   : > { %v425_v19 = vsub.f32 %v421_v11, %v424_v18 }
 0x205   : > { %v426_v20 = vmul.f32 1.442695, %v425_v19 }
 0x207   : > { %1235 = vpow2.f32 %v426_v20 }
 0x211   : > { %v1236_v21 = vpop.eup %1235 }
 0x212   : > { %v428_v22 = vsel %vm374_vm1, %v1236_v21, 0.0 }
 0x213   : > { %429 = vadd.xlane.f32.xlu0 %v428_v22 }
 0x229   : > { %487 = vrot.lane.b32.xlu0 %v370_v6, %s1486_s1 }
 0x2a0   : > { %v430_v28 = vpop.xlane.xlu0 %429 }
 0x2a1   : > { %1237 = vrcp.f32 %v430_v28 }
 0x2a4   : > { %v488_v35 = vpop.permute.xlu0 %487 }
 0x2ab   : > { %v1238_v29 = vpop.eup %1237 }
 0x2ac   : > { %v432_v31 = vmul.f32 %v1238_v29, %v1236_v21 }
 0x2ae   : > { %v439_v33 = vpack.c.bf16 %v432_v31, %v432_v31 }
 0x2b0   : > { %1122 = vmatmul.mubr.msk.bf16.vlgmr.msra.gmra.mrb[0].mxu1 %vm374_vm1, %v439_v33 }
 0x2b1   : > { %1126 = vmatpush3.bf16.xpose.msra.mxu1 %v496_v32  ;;  %1127 = vmatprep.mubr.msk.bf16.mxu1 %vm1484_vm0, %v1483_v0 }
 0x2b2   : > { %1137 = vmatprep.subr.bf16.mxu1 %v1483_v0 }
 0x2b8   : > { %1128 = vmatmul.mubr.msk.bf16.vlgmr.msra.gmra.mrb[4].mxu1 %vm374_vm1, %v488_v35 }
 0x2b9   : > { %1138 = vmatpush3.bf16.xpose.msra.mxu1 %v610_v37  ;;  %1139 = vmatprep.mubr.msk.bf16.mxu1 %vm1484_vm0, %v1483_v0 }
 0x2ba   : > { %1149 = vmatprep.subr.bf16.mxu1 %v1483_v0 }
 0x2c0   : > { %1140 = vmatmul.mubr.msk.bf16.vlgmr.msra.gmra.mrb[8].mxu1 %vm374_vm1, %v603_v36 }
 0x2c1   : > { %1150 = vmatpush3.bf16.xpose.msra.mxu1 %v725_v39  ;;  %1151 = vmatprep.mubr.msk.bf16.mxu1 %vm1484_vm0, %v1483_v0 }
 0x2c8   : > { %1152 = vmatmul.mubr.msk.bf16.vlgmr.msra.gmra.mrb[12].mxu1 %vm374_vm1, %v718_v40 }
 0x383   : > { %v1797_v41 = vpop.f32.mrb[0].mxu1 }
 0x384   : > { %v1123_v42 = vpop.f32.mrb[1].mxu1 }
 0x385   : > { %v483_v43 = vpop.f32.mrb[2].mxu1 }
 0x386   : > { %v1124_v44 = vpop.f32.mrb[3].mxu1 }
 0x38b   : > { %v532_v45 = vpop.f32.mrb[4].mxu1 }
 0x38c   : > { %v538_v46 = vsel %vm368_vm2, %v532_v45, -1e+09  ;;  %v1129_v47 = vpop.f32.mrb[5].mxu1 }
 0x38d   : > { %v535_v48 = vpop.f32.mrb[6].mxu1  ;;  %v539_v49 = vsel %vm374_vm1, %v538_v46, -inf }
 0x38e   : > { %540 = vmax.xlane.f32.xlu1 %v539_v49  ;;  %v1130_v50 = vpop.f32.mrb[7].mxu1 }
 0x393   : > { %v646_v51 = vpop.f32.mrb[8].mxu1 }
 0x394   : > { %v652_v52 = vsel %vm368_vm2, %v646_v51, -1e+09  ;;  %v1141_v53 = vpop.f32.mrb[9].mxu1 }
 0x395   : > { %v653_v54 = vsel %vm374_vm1, %v652_v52, -inf  ;;  %v649_v55 = vpop.f32.mrb[10].mxu1 }
 0x396   : > { %654 = vmax.xlane.f32.xlu0 %v653_v54  ;;  %v1142_v56 = vpop.f32.mrb[11].mxu1 }
 0x39b   : > { %v761_v57 = vpop.f32.mrb[12].mxu1 }
 0x39c   : > { %v767_v58 = vsel %vm368_vm2, %v761_v57, -1e+09  ;;  %v1153_v59 = vpop.f32.mrb[13].mxu1 }
 0x39d   : > { %v768_v60 = vsel %vm374_vm1, %v767_v58, -inf  ;;  %v764_v61 = vpop.f32.mrb[14].mxu1 }
 0x39e   : > { %769 = vmax.xlane.f32.xlu1 %v768_v60  ;;  %v1154_v62 = vpop.f32.mrb[15].mxu1 }
 0x3af   : > { %551 = vrot.lane.b32.xlu1 %v1775_v25, %s1486_s1 }
 0x3b3   : > { %666 = vrot.lane.b32.xlu1 %v1763_v17, %s1486_s1 }
 0x41b   : > { %v541_v63 = vpop.xlane.xlu1 %540 }
 0x41c   : > { %v542_v1 = vsub.f32 %v538_v46, %v541_v63 }
 0x41e   : > { %v543_v2 = vmul.f32 1.442695, %v542_v1 }
 0x420   : > { %1239 = vpow2.f32 %v543_v2 }
 0x423   : > { %v655_v3 = vpop.xlane.xlu0 %654 }
 0x424   : > { %v656_v4 = vsub.f32 %v652_v52, %v655_v3 }
 0x426   : > { %v657_v5 = vmul.f32 1.442695, %v656_v4 }
 0x428   : > { %1241 = vpow2.f32 %v657_v5 }
 0x42a   : > { %v1240_v6 = vpop.eup %1239 }
 0x42b   : > { %v770_v7 = vpop.xlane.xlu1 %769  ;;  %v545_v8 = vsel %vm374_vm1, %v1240_v6, 0.0 }
 0x42c   : > { %546 = vadd.xlane.f32.xlu0 %v545_v8  ;;  %v771_v14 = vsub.f32 %v767_v58, %v770_v7 }
 0x42e   : > { %v772_v15 = vmul.f32 1.442695, %v771_v14 }
 0x42f   : > { %v552_v9 = vpop.permute.xlu1 %551 }
 0x430   : > { %v555_v10 = vsel %vm374_vm1, %v552_v9, %v1763_v17  ;;  %1243 = vpow2.f32 %v772_v15 }
 0x431   : > { %v560_v11 = vsel %vm443_vm3, %v555_v10, 0 }
 0x432   : > { %v1242_v12 = vpop.eup %1241  ;;  %1132 = vmatpush3.bf16.msra.mxu0 %v560_v11 }
 0x433   : > { %v659_v13 = vsel %vm374_vm1, %v1242_v12, 0.0  ;;  %1143 = vmatprep.subr.bf16.mxu0 %v1483_v0  ;;  %v667_v20 = vpop.permute.xlu1 %666 }
 0x434   : > { %660 = vadd.xlane.f32.xlu1 %v659_v13 }
 0x43a   : > { %v1244_v16 = vpop.eup %1243 }
 0x43b   : > { %v774_v18 = vsel %vm374_vm1, %v1244_v16, 0.0 }
 0x442   : > { %664 = vrot.lane.b32.xlu0 %v1775_v25, %s1487_s16 }
 0x445   : > { %779 = vrot.lane.b32.xlu1 %v1775_v25, %s1488_s13 }
 0x461   : > { %775 = vadd.xlane.f32.xlu0 %v774_v18 }
 0x477   : > { %781 = vrot.lane.b32.xlu0 %v1763_v17, %s1487_s16 }
 0x47b   : > { %852 = vrot.lane.b32.xlu0 %v1797_v41, %s1486_s1 }
 0x4b9   : > { %v547_v19 = vpop.xlane.xlu0 %546 }
 0x4ba   : > { %1245 = vrcp.f32 %v547_v19 }
 0x4bd   : > { %v665_v22 = vpop.permute.xlu0 %664 }
 0x4be   : > { %v670_v25 = vsel %vm374_vm1, %v665_v22, %v667_v20 }
 0x4bf   : > { %v675_v27 = vsel %vm443_vm3, %v670_v25, 0 }
 0x4c1   : > { %v661_v21 = vpop.xlane.xlu1 %660 }
 0x4c2   : > { %1247 = vrcp.f32 %v661_v21 }
 0x4c4   : > { %v1246_v23 = vpop.eup %1245 }
 0x4c5   : > { %v549_v24 = vmul.f32 %v1246_v23, %v1240_v6  ;;  %v780_v31 = vpop.permute.xlu1 %779 }
 0x4c7   : > { %v556_v26 = vpack.c.bf16 %v549_v24, %v549_v24 }
 0x4c9   : > { %1134 = vmatmul.mubr.msk.bf16.vlgmr.msra.gmra.mrb[4].mxu0 %vm374_vm1, %v556_v26 }
 0x4ca   : > { %1144 = vmatpush3.bf16.msra.mxu0 %v675_v27  ;;  %1145 = vmatprep.mubr.msk.bf16.mxu0 %vm1484_vm0, %v1483_v0 }
 0x4cb   : > { %1155 = vmatprep.subr.bf16.mxu0 %v1483_v0 }
 0x4cc   : > { %v1248_v17 = vpop.eup %1247 }
 0x4cd   : > { %v663_v28 = vmul.f32 %v1248_v17, %v1242_v12 }
 0x4cf   : > { %v671_v29 = vpack.c.bf16 %v663_v28, %v663_v28 }
 0x4d1   : > { %1146 = vmatmul.mubr.msk.bf16.vlgmr.msra.gmra.mrb[8].mxu0 %vm374_vm1, %v671_v29 }
 0x4d2   : > { %1157 = vmatprep.mubr.msk.bf16.mxu0 %vm1484_vm0, %v1483_v0 }
 0x4ee   : > { %v776_v30 = vpop.xlane.xlu0 %775 }
 0x4ef   : > { %1249 = vrcp.f32 %v776_v30 }
 0x4f2   : > { %v782_v32 = vpop.permute.xlu0 %781 }
 0x4f3   : > { %v785_v33 = vsel %vm374_vm1, %v780_v31, %v782_v32 }
 0x4f4   : > { %v790_v34 = vsel %vm443_vm3, %v785_v33, 0 }
 0x4f5   : > { %1156 = vmatpush3.bf16.msra.mxu0 %v790_v34 }
 0x4f6   : > { %v853_v50 = vpop.permute.xlu0 %852 }
 0x4f9   : > { %v1250_v35 = vpop.eup %1249 }
 0x4fa   : > { %v778_v36 = vmul.f32 %v1250_v35, %v1244_v16 }
 0x4fc   : > { %v786_v37 = vpack.c.bf16 %v778_v36, %v778_v36 }
 0x4fe   : > { %1158 = vmatmul.mubr.msk.bf16.vlgmr.msra.gmra.mrb[12].mxu0 %vm374_vm1, %v786_v37 }
 0x59c   : > { %v596_v38 = vpop.f32.mrb[4].mxu0 }
 0x59d   : > { %833 = vrot.lane.b32.xlu1 %v596_v38, %s1485_s28  ;;  %v1135_v39 = vpop.f32.mrb[5].mxu0  ;;  %v861_v54 = vsel %vm374_vm1, %v853_v50, %v596_v38 }
 0x59e   : > { %v599_v40 = vpop.f32.mrb[6].mxu0 }
 0x59f   : > { %v1136_v0 = vpop.f32.mrb[7].mxu0 }
 0x5a4   : > { %v711_v42 = vpop.f32.mrb[8].mxu0 }
 0x5a5   : > { %855 = vrot.lane.b32.xlu0 %v711_v42, %s1485_s28  ;;  %837 = vrot.lane.b32.xlu1 %v711_v42, %s1489_s24  ;;  %v1147_v43 = vpop.f32.mrb[9].mxu0  ;;  %s1375_s28 = sshll.u32 %s1491_s15, 4  ;;  %s1376_s28 = int_to_ptr.vmem [resolvable:$false] %s1375_s28 }
 0x5a6   : > { %v714_v44 = vpop.f32.mrb[10].mxu0  ;;  %s1377_s1 = scalar_lea.vmem %s1376_s28, 256  ;;  %p1378_p8 = scmp.lt.s32.totalorder %s1855_s27, %s1376_s28 }
 0x5a7   : > { %v1148_v45 = vpop.f32.mrb[11].mxu0  ;;  %p1379_p13 = scmp.lt.s32.totalorder %s1377_s1, %s1371_s12 }
 0x5a9   : > { %p1380_p11 = por %p1379_p13, %p1378_p8 }
 0x5ab   : > { %p1381_p1 = pnand %p1380_p11, %p1374_p0 }
 0x5d1   : > { %v826_v46 = vpop.f32.mrb[12].mxu0 }
 0x5d2   : > { %858 = vrot.lane.b32.xlu0 %v826_v46, %s1489_s24  ;;  %841 = vrot.lane.b32.xlu1 %v826_v46, %s1490_s7  ;;  %v1159_v47 = vpop.f32.mrb[13].mxu0 }
 0x5d3   : > { %v829_v48 = vpop.f32.mrb[14].mxu0 }
 0x5d4   : > { %v1160_v49 = vpop.f32.mrb[15].mxu0 }
 0x60f   : > { %v834_v51 = vpop.permute.xlu1 %833 }
 0x610   : > { %v844_v55 = vsel %vm374_vm1, %v1797_v41, %v834_v51 }
 0x617   : > { %v856_v52 = vpop.permute.xlu0 %855  ;;  %v838_v53 = vpop.permute.xlu1 %837 }
 0x618   : > { %v862_v56 = vsel %vm845_vm4, %v861_v54, %v856_v52  ;;  %v846_v57 = vsel %vm845_vm4, %v844_v55, %v838_v53 }
 0x644   : > { %v859_v58 = vpop.permute.xlu0 %858  ;;  %v842_v59 = vpop.permute.xlu1 %841 }
 0x645   : > { %v863_v60 = vsel %vm847_vm5, %v862_v56, %v859_v58  ;;  %v848_v61 = vsel %vm847_vm5, %v846_v57, %v842_v59 }
 0x646   : > { %850 = vst.msk [vmem:[%s351_s8] sm:$0xff] %vm849_vm6, %v848_v61  ;;  %864 = vst.msk [vmem:[%s358_s20] sm:$0xff] %vm849_vm6, %v863_v60 }
 0x647   : > { %1384 = shalt.err (!%p1381_p1)
}
 0x648   : > { %s1385_s16 = scalar_lea.hbm %s1853_s10, 128  ;;  %s1389_s7 = scalar_lea.hbm %s1930_s4, 256 }
 0x649   : > { %p1386_p10 = scmp.ne.s32.totalorder %s1853_s10, %s1385_s16  ;;  %p1390_p9 = scmp.lt.u32.totalorder %s1853_s10, %s1930_s4 }
 0x64a   : > { %p1391_p5 = scmp.lt.u32.totalorder %s1389_s7, %s1385_s16  ;;  %p1393_p3 = scmp.lt.u32.totalorder %s1385_s16, %s1853_s10 }
 0x64b   : > { %p1387_p4 = pnand %p1386_p10, %p1956_p6 }
 0x64c   : > { %p1392_p2 = por %p1391_p5, %p1390_p9 }
 0x64d   : > { %p1388_p7 = pneg %p1387_p4 }
 0x64e   : > { %p1394_p12 = por %p1393_p3, %p1392_p2 }
 0x650   : > { %p1395_p0 = pnand %p1394_p12, %p1388_p7 }
 0x652   : > { %1398 = shalt.err (!%p1395_p0)
}
 0x653   : > { %1169 = dma.vmem_to_hbm [thread:$0]  (%p1956_p6), %s1855_s27, 128, %s1853_s10, %s866_s26  }
 0x654   : > { %s871_s20 = scalar_lea.sflag [#allocation12], %s1716_s23  ;;  %s1399_s14 = scalar_lea.vmem %s1862_s11, 128 }
 0x655   : > { %p1400_p8 = scmp.ne.s32.totalorder %s1862_s11, %s1399_s14  ;;  %s1492_s9 = smov [#allocation11]  }
 0x656   : > { %s1403_s22 = sshll.u32 %s1492_s9, 4  ;;  %s1404_s22 = int_to_ptr.vmem [resolvable:$false] %s1403_s22 }
 0x657   : > { %p1401_p13 = pnand %p1400_p8, %p1956_p6  ;;  %s1405_s17 = scalar_lea.vmem %s1404_s22, 256 }
 0x658   : > { %p1406_p1 = scmp.lt.s32.totalorder %s1862_s11, %s1404_s22  ;;  %p1407_p10 = scmp.lt.s32.totalorder %s1405_s17, %s1399_s14 }
 0x659   : > { %p1402_p11 = pneg %p1401_p13 }
 0x65a   : > { %p1408_p4 = por %p1407_p10, %p1406_p1 }
 0x65c   : > { %p1409_p7 = pnand %p1408_p4, %p1402_p11 }
 0x65e   : > { %1412 = shalt.err (!%p1409_p7)
}
 0x65f   : > { %s1413_s23 = scalar_lea.hbm %s1860_s25, 128  ;;  %s1417_s26 = scalar_lea.hbm %s1931_s5, 256 }
 0x660   : > { %p1414_p9 = scmp.ne.s32.totalorder %s1860_s25, %s1413_s23  ;;  %p1418_p3 = scmp.lt.u32.totalorder %s1860_s25, %s1931_s5 }
 0x661   : > { %p1419_p12 = scmp.lt.u32.totalorder %s1417_s26, %s1413_s23  ;;  %p1421_p8 = scmp.lt.u32.totalorder %s1413_s23, %s1860_s25 }
 0x662   : > { %p1415_p5 = pnand %p1414_p9, %p1956_p6 }
 0x663   : > { %p1420_p0 = por %p1419_p12, %p1418_p3 }
 0x664   : > { %p1416_p2 = pneg %p1415_p5 }
 0x665   : > { %p1422_p13 = por %p1421_p8, %p1420_p0 }
 0x667   : > { %p1423_p11 = pnand %p1422_p13, %p1416_p2 }
 0x669   : > { %1426 = shalt.err (!%p1423_p11)
}
 0x66a   : > { %1170 = dma.vmem_to_hbm [thread:$0]  (%p1956_p6), %s1862_s11, 128, %s1860_s25, %s871_s20  }
 0x66b PF: > { %s909_s28 = sand.u32 1, %s1465_s18   ;;  %p1957_p1 = scmp.ne.s32.totalorder %s1945_s30, 0 }
 0x66c   : > { %p1958_p10 = scmp.ge.s32.totalorder %s1477_s21, 2  ;;  %s910_s1 = scalar_lea.sflag [#allocation4], %s909_s28 }
 0x66e   : > { %p1187_p4 = pnand %p1958_p10, %p1957_p1 }
 0x670   : > { %1456 = dma.done.wait (!%p1187_p4), %s910_s1, 128  }
 0x671   : > { %1458 = vsyncadd (!%p1187_p4), %s910_s1, 4294967168  ;;  %s919_s16 = scalar_lea.sflag [#allocation12], %s909_s28 }
 0x672   : > { %1460 = dma.done.wait (!%p1187_p4), %s919_s16, 128  }
 0x673   : > { %1462 = vsyncadd (!%p1187_p4), %s919_s16, 4294967168  ;;  %s1959_s21 = sld [smem:[#allocation19_spill]]  ;;  %s1960_s29 = sld [smem:[#allocation18_spill]] }
 0x674   : > { %s1961_s20 = sld [smem:[#allocation20_spill]]  ;;  %s1962_s18 = smov %s1469_s19 }
 0x679   : > { %p28_p6 = scmp.ge.s32.totalorder %s1959_s21, 4   ;;  %s1963_s19 = smov %s1960_s29 }
 0x67b   :  { %30 = sbr.rel (!%p28_p6) target bundleno = 13 (0xd), region = 135 }
 0x682   :  { %924 = vsyncpa [#allocation3], 1 }
 0x683   :  { %926 = vsyncpa [#allocation3 + $0x1], 1 }
 0x684   :  { %927 = vsyncpa [#allocation6], 1 }
 0x685   :  { %929 = vsyncpa [#allocation6 + $0x1], 1 }
 0x686   :  { %930 = vsyncpa [#allocation9], 1 }
 0x687   :  { %932 = vsyncpa [#allocation9 + $0x1], 1 }
 0x688   :  { %933 = vsyncpa [#allocation4], 1 }
 0x689   :  { %935 = vsyncpa [#allocation4 + $0x1], 1 }
 0x68a   :  { %936 = vsyncpa [#allocation12], 1 }
 0x68b   :  { %938 = vsyncpa [#allocation12 + $0x1], 1 }

</bundles_post_ra>
